<compile_context>
chip_gen: v6e
topology: v6e:2x2x1
jax: 0.10.0
libtpu: 0.0.40
codegen_flags: <defaults>
</compile_context>

<pallas_src>
import jax
import jax.numpy as jnp
import numpy as np
from jax.experimental import pallas as pl
from jax.experimental.pallas import tpu as pltpu

POS_WEIGHT = 2.0
NUM_CH = 6
_LANE = 128


# ----------------------------------------------------------------------------
# Pallas kernel: unified PPXYZBG loss, reduced to per-(batch,channel) sums
# ----------------------------------------------------------------------------
def _unified_loss_sum_kernel(chw_ref, pred_ref, tgt_ref, wmap_ref, csum_ref):
    # chw_ref : (6,)              f32  SMEM  per-channel weights (scalar prefetch)
    # pred_ref: (1, 1, r_tile, L) f32  VMEM  predictions (one batch, one channel)
    # tgt_ref : (1, 1, r_tile, L) f32  VMEM  targets
    # wmap_ref: (1, 1, r_tile, L) f32  VMEM  per-pixel loss weights
    # csum_ref: (1, 1, 1, L)      f32  VMEM  per-lane partial sums; resident
    #                                        accumulator across the hw-tile axis.
    c = pl.program_id(1)
    t = pl.program_id(2)

    @pl.when(t == 0)
    def _init():
        csum_ref[...] = jnp.zeros_like(csum_ref)

    x = pred_ref[0, 0]          # (r_tile, L) dense slab
    y = tgt_ref[0, 0]
    w = wmap_ref[0, 0]
    cw = chw_ref[c]             # scalar per-channel weight from SMEM

    def _accum(l):
        # weight map applied element-wise, channel weight folded into the sum.
        contrib = jnp.sum(l * w, axis=0, keepdims=True) * cw        # (1, L)
        csum_ref[...] = csum_ref[...] + contrib[None, None]

    @pl.when(c == 0)
    def _bce():
        # BCEWithLogitsLoss(pos_weight): pw*y*softplus(-x) + (1-y)*softplus(x)
        # with a single stable softplus evaluation (softplus(-x) = sp - x).
        sp = jnp.maximum(x, 0.0) + jnp.log1p(jnp.exp(-jnp.abs(x)))  # softplus(x)
        _accum(POS_WEIGHT * y * (sp - x) + (1.0 - y) * sp)

    @pl.when(jnp.logical_or(c == 1, c == 5))
    def _mse():
        d = x - y
        _accum(d * d)

    @pl.when(jnp.logical_and(c >= 2, c <= 4))
    def _smooth_l1():
        d = x - y
        ad = jnp.abs(d)
        _accum(jnp.where(ad < 1.0, 0.5 * d * d, ad - 0.5))


def _choose_row_tile(rows, target=512):
    """Largest legal row tile (multiple of 8 dividing `rows`, or full extent)."""
    if rows <= target:
        return rows
    t = target - (target % 8)
    while t >= 8:
        if rows % t == 0:
            return t
        t -= 8
    return rows


def unified_loss_channel_sums(output, target, weight_map, ch_weight):
    """Per-channel total sums (C,) of the weighted unified PPXYZBG loss."""
    B, C, H, W = output.shape
    assert C == NUM_CH
    HW = H * W

    # Free, contiguous reshape only (no transpose / pad pass in the wrapper).
    if HW % _LANE == 0:
        lane = _LANE
    else:
        lane = HW            # rare fallback: whole spatial extent on the lane axis
    rows = HW // lane
    r_tile = _choose_row_tile(rows)      # 512x128xf32 = 256 KiB/input/step max
    n_tiles = rows // r_tile

    pred = output.astype(jnp.float32).reshape(B, C, rows, lane)
    tgt = target.astype(jnp.float32).reshape(B, C, rows, lane)
    wmap = weight_map.astype(jnp.float32).reshape(B, C, rows, lane)
    chw = ch_weight.astype(jnp.float32)

    in_spec = pl.BlockSpec((1, 1, r_tile, lane),
                           lambda b, c, t, chw_sref: (b, c, t, 0))
    out_spec = pl.BlockSpec((1, 1, 1, lane),
                            lambda b, c, t, chw_sref: (b, c, 0, 0))

    n_elem = B * C * HW
    cost = pl.CostEstimate(
        flops=10 * n_elem,
        transcendentals=2 * B * HW,                    # exp + log1p, BCE channel only
        bytes_accessed=3 * n_elem * 4 + B * C * lane * 4,
    )

    csum = pl.pallas_call(
        _unified_loss_sum_kernel,
        out_shape=jax.ShapeDtypeStruct((B, C, 1, lane), jnp.float32),
        grid_spec=pltpu.PrefetchScalarGridSpec(
            num_scalar_prefetch=1,
            grid=(B, C, n_tiles),
            in_specs=[in_spec, in_spec, in_spec],
            out_specs=out_spec,
        ),
        compiler_params=pltpu.CompilerParams(
            dimension_semantics=("parallel", "parallel", "arbitrary"),
        ),
        cost_estimate=cost,
    )(chw, pred, tgt, wmap)

    # Tiny final reduction (B*C*128 floats) done in XLA.
    return jnp.sum(csum, axis=(0, 2, 3))               # (C,)


# ----------------------------------------------------------------------------
# Module-level glue replicating StableVAREmitterLoss.forward semantics
# ----------------------------------------------------------------------------
def _get_active_scales(current_epoch, warmup_epochs, num_scales):
    if current_epoch < warmup_epochs // 4:
        return [0]
    elif current_epoch < warmup_epochs // 2:
        return [0, 1]
    elif current_epoch < warmup_epochs:
        return [0, 1, 2]
    else:
        return list(range(num_scales))


def _progressive_scale_weight(scale_idx, scale_weights, current_epoch, warmup_epochs):
    base = scale_weights[min(scale_idx, len(scale_weights) - 1)]
    progress = min(current_epoch / warmup_epochs, 1.0)
    if scale_idx == 0:
        return base * (1.5 - 0.5 * progress)
    return base * (0.5 + 0.5 * progress)


def stable_var_emitter_loss_forward(
    predictions,
    targets,
    ch_weight,
    scale_weights=(0.1, 0.3, 0.6, 1.0),
    current_epoch=0,
    warmup_epochs=20,
):
    active = _get_active_scales(current_epoch, warmup_epochs, len(scale_weights))
    total_loss = jnp.float32(0.0)
    comps = {}
    channel_losses = []  # feeds AdaptiveChannelWeights (no-op at epoch 0)

    for scale_idx, (scale_key, scale_pred) in enumerate(predictions.items()):
        if scale_idx not in active:
            continue
        if "unified_output" not in scale_pred:
            # TODO(synk): legacy loss path (data-dependent emitter matching) not implemented.
            continue
        output = scale_pred["unified_output"]
        target = targets.get(f"{scale_key}_unified", targets.get("unified"))
        weight_map = targets.get(f"{scale_key}_weight", targets.get("weight"))
        if weight_map is None:
            weight_map = jnp.ones_like(output)

        B, C, H, W = output.shape
        ch_sums = unified_loss_channel_sums(output, target, weight_map, ch_weight)
        # unified_loss.sum(dim=(1,2,3)).mean() == total_sum / B
        scale_loss = ch_sums.sum() / B
        # unified_loss.mean(dim=(0,2,3)) == per-channel sums / (B*H*W)
        channel_losses.append(ch_sums / float(B * H * W))

        sw = _progressive_scale_weight(scale_idx, scale_weights, current_epoch, warmup_epochs)
        weighted = sw * scale_loss
        total_loss = total_loss + weighted
        comps[f"{scale_key}_total"] = scale_loss
        comps[f"{scale_key}_weighted"] = weighted

    # TODO(synk): AdaptiveChannelWeights.update_weights is host-side, stateful
    # bookkeeping (no-op at epoch 0 in PyTorch as well); not ported to the kernel.
    comps["total_loss"] = total_loss
    comps["num_active_scales"] = len(active)
    return comps


# ----------------------------------------------------------------------------
# Pure-JAX reference of the unified loss (for correctness check)
# ----------------------------------------------------------------------------
def _ref_unified_loss(output, target, weight, chw):
    x, y = output, target
    l0 = POS_WEIGHT * y[:, 0] * jnp.logaddexp(0.0, -x[:, 0]) + (1.0 - y[:, 0]) * jnp.logaddexp(0.0, x[:, 0])
    l1 = (x[:, 1] - y[:, 1]) ** 2
    locs = []
    for c in (2, 3, 4):
        d = x[:, c] - y[:, c]
        ad = jnp.abs(d)
        locs.append(jnp.where(ad < 1.0, 0.5 * d * d, ad - 0.5))
    l5 = (x[:, 5] - y[:, 5]) ** 2
    ch = jnp.stack([l0, l1, locs[0], locs[1], locs[2], l5], axis=1)
    ch = ch * weight
    ch = ch * chw.reshape(1, NUM_CH, 1, 1)
    return ch


# ----------------------------------------------------------------------------
# Demo
# ----------------------------------------------------------------------------
if __name__ == "__main__":
    key = jax.random.PRNGKey(0)
    B, C, H, W = 2, 6, 16, 16
    n_scales = 4

    # Deterministic "parameters" from __init__ (buffers / constants)
    ch_weight = jnp.array([1.5, 1.0, 1.2, 1.2, 0.8, 0.8], dtype=jnp.float32)
    scale_weights = (0.1, 0.3, 0.6, 1.0)
    current_epoch = 0
    warmup_epochs = 20

    keys = jax.random.split(key, 4 * n_scales)
    predictions = {}
    targets = {}
    for i in range(n_scales):
        kp, kt, kw, kb = keys[4 * i: 4 * i + 4]
        predictions[f"scale_{i}"] = {
            "unified_output": jax.random.normal(kp, (B, C, H, W), dtype=jnp.float32)
        }
        tgt = jax.random.normal(kt, (B, C, H, W), dtype=jnp.float32)
        # make the prob-channel target look like a binary-ish probability map
        tgt = tgt.at[:, 0].set(jax.random.uniform(kb, (B, H, W), dtype=jnp.float32))
        targets[f"scale_{i}_unified"] = tgt
        targets[f"scale_{i}_weight"] = jax.random.uniform(
            kw, (B, C, H, W), dtype=jnp.float32, minval=0.5, maxval=1.5
        )

    comps = stable_var_emitter_loss_forward(
        predictions, targets, ch_weight, scale_weights, current_epoch, warmup_epochs
    )
    comps = jax.tree_util.tree_map(
        lambda x: jax.block_until_ready(x) if isinstance(x, jax.Array) else x, comps
    )

    # ---- correctness check against a pure-JAX reference ----
    ref_total = jnp.float32(0.0)
    active = _get_active_scales(current_epoch, warmup_epochs, len(scale_weights))
    for scale_idx, scale_key in enumerate(predictions.keys()):
        if scale_idx not in active:
            continue
        out = predictions[scale_key]["unified_output"]
        tgt = targets[f"{scale_key}_unified"]
        wmp = targets[f"{scale_key}_weight"]
        ref_elem = _ref_unified_loss(out, tgt, wmp, ch_weight)
        ref_scale_loss = ref_elem.sum(axis=(1, 2, 3)).mean()
        sw = _progressive_scale_weight(scale_idx, scale_weights, current_epoch, warmup_epochs)
        ref_total = ref_total + sw * ref_scale_loss
        np.testing.assert_allclose(
            np.asarray(comps[f"{scale_key}_total"]), np.asarray(ref_scale_loss),
            rtol=1e-5, atol=1e-4,
        )
    np.testing.assert_allclose(
        np.asarray(comps["total_loss"]), np.asarray(ref_total), rtol=1e-5, atol=1e-4
    )
    assert comps["num_active_scales"] == 1

    print("KERNEL_OK")
</pallas_src>

<mosaic_0001>
module attributes {stable_mosaic.version = 11 : i64} {
  func.func @_unified_loss_sum_kernel(%arg0: i32, %arg1: i32, %arg2: i32, %arg3: memref<6xf32, #tpu.memory_space<smem>>, %arg4: memref<1x1x2x128xf32, #tpu.memory_space<vmem>>, %arg5: memref<1x1x2x128xf32, #tpu.memory_space<vmem>>, %arg6: memref<1x1x2x128xf32, #tpu.memory_space<vmem>>, %arg7: memref<1x1x1x128xf32, #tpu.memory_space<vmem>>) attributes {dimension_semantics = [#tpu.dimension_semantics<parallel>, #tpu.dimension_semantics<parallel>, #tpu.dimension_semantics<arbitrary>], iteration_bounds = array<i64: 2, 6, 1>, scalar_prefetch = 1 : i64, scratch_operands = 0 : i64, tpu.core_type = #tpu.core_type<tc>, window_params = [{transform_indices = @transform_0, window_bounds = array<i64: 1, 1, 2, 128>}, {transform_indices = @transform_1, window_bounds = array<i64: 1, 1, 2, 128>}, {transform_indices = @transform_2, window_bounds = array<i64: 1, 1, 2, 128>}, {transform_indices = @transform_3, window_bounds = array<i64: 1, 1, 1, 128>}]} {
    %c0_i32 = arith.constant 0 : i32
    %0 = arith.cmpi eq, %arg2, %c0_i32 : i32
    %1 = arith.extui %0 : i1 to i32
    %c0_i32_0 = arith.constant 0 : i32
    %2 = arith.cmpi ne, %1, %c0_i32_0 : i32
    scf.if %2 {
      %cst = arith.constant 0.000000e+00 : f32
      %24 = vector.broadcast %cst : f32 to vector<1x1x1x128xf32>
      %c0_16 = arith.constant 0 : index
      %c0_17 = arith.constant 0 : index
      %c0_18 = arith.constant 0 : index
      %c0_19 = arith.constant 0 : index
      %25 = vector.load %arg7[%c0_16, %c0_17, %c0_18, %c0_19] : memref<1x1x1x128xf32, #tpu.memory_space<vmem>>, vector<1x1x1x128xf32>
      tpu.vector_store %arg7[%c0_16, %c0_17, %c0_18, %c0_19], %24 {strides = array<i32>} : memref<1x1x1x128xf32, #tpu.memory_space<vmem>>, vector<1x1x1x128xf32>,
    } else {
    }
    %c0 = arith.constant 0 : index
    %c0_1 = arith.constant 0 : index
    %c0_2 = arith.constant 0 : index
    %c0_3 = arith.constant 0 : index
    %3 = vector.load %arg4[%c0, %c0_1, %c0_2, %c0_3] : memref<1x1x2x128xf32, #tpu.memory_space<vmem>>, vector<1x1x2x128xf32>
    %4 = vector.shape_cast %3 : vector<1x1x2x128xf32> to vector<2x128xf32>
    %c0_4 = arith.constant 0 : index
    %c0_5 = arith.constant 0 : index
    %c0_6 = arith.constant 0 : index
    %c0_7 = arith.constant 0 : index
    %5 = vector.load %arg5[%c0_4, %c0_5, %c0_6, %c0_7] : memref<1x1x2x128xf32, #tpu.memory_space<vmem>>, vector<1x1x2x128xf32>
    %6 = vector.shape_cast %5 : vector<1x1x2x128xf32> to vector<2x128xf32>
    %c0_8 = arith.constant 0 : index
    %c0_9 = arith.constant 0 : index
    %c0_10 = arith.constant 0 : index
    %c0_11 = arith.constant 0 : index
    %7 = vector.load %arg6[%c0_8, %c0_9, %c0_10, %c0_11] : memref<1x1x2x128xf32, #tpu.memory_space<vmem>>, vector<1x1x2x128xf32>
    %8 = vector.shape_cast %7 : vector<1x1x2x128xf32> to vector<2x128xf32>
    %9 = arith.index_cast %arg1 : i32 to index
    %10 = memref.load %arg3[%9] : memref<6xf32, #tpu.memory_space<smem>>
    %c0_i32_12 = arith.constant 0 : i32
    %11 = arith.cmpi eq, %arg1, %c0_i32_12 : i32
    %12 = arith.extui %11 : i1 to i32
    %c0_i32_13 = arith.constant 0 : i32
    %13 = arith.cmpi ne, %12, %c0_i32_13 : i32
    scf.if %13 {
      %cst = arith.constant 0.000000e+00 : f32
      %24 = vector.broadcast %cst : f32 to vector<2x128xf32>
      %25 = arith.maximumf %4, %24 : vector<2x128xf32>
      %26 = math.absf %4 : vector<2x128xf32>
      %cst_16 = arith.constant 0.000000e+00 : f32
      %27 = vector.broadcast %cst_16 : f32 to vector<2x128xf32>
      %28 = arith.subf %27, %26 : vector<2x128xf32>
      %29 = math.exp %28 : vector<2x128xf32>
      %30 = math.log1p %29 : vector<2x128xf32>
      %31 = arith.addf %25, %30 : vector<2x128xf32>
      %cst_17 = arith.constant 2.000000e+00 : f32
      %32 = vector.broadcast %cst_17 : f32 to vector<2x128xf32>
      %33 = arith.mulf %32, %6 : vector<2x128xf32>
      %34 = arith.subf %31, %4 : vector<2x128xf32>
      %35 = arith.mulf %33, %34 : vector<2x128xf32>
      %cst_18 = arith.constant 1.000000e+00 : f32
      %36 = vector.broadcast %cst_18 : f32 to vector<2x128xf32>
      %37 = arith.subf %36, %6 : vector<2x128xf32>
      %38 = arith.mulf %37, %31 : vector<2x128xf32>
      %39 = arith.addf %35, %38 : vector<2x128xf32>
      %40 = arith.mulf %39, %8 : vector<2x128xf32>
      %cst_19 = arith.constant dense<0.000000e+00> : vector<128xf32>
      %41 = vector.multi_reduction <add>, %40, %cst_19 [0] : vector<2x128xf32> to vector<128xf32>
      %42 = vector.shape_cast %41 : vector<128xf32> to vector<1x128xf32>
      %43 = vector.broadcast %10 : f32 to vector<1x128xf32>
      %44 = arith.mulf %42, %43 : vector<1x128xf32>
      %c0_20 = arith.constant 0 : index
      %c0_21 = arith.constant 0 : index
      %c0_22 = arith.constant 0 : index
      %c0_23 = arith.constant 0 : index
      %45 = vector.load %arg7[%c0_20, %c0_21, %c0_22, %c0_23] : memref<1x1x1x128xf32, #tpu.memory_space<vmem>>, vector<1x1x1x128xf32>
      %46 = vector.shape_cast %44 : vector<1x128xf32> to vector<1x1x1x128xf32>
      %47 = arith.addf %45, %46 : vector<1x1x1x128xf32>
      %c0_24 = arith.constant 0 : index
      %c0_25 = arith.constant 0 : index
      %c0_26 = arith.constant 0 : index
      %c0_27 = arith.constant 0 : index
      %48 = vector.load %arg7[%c0_24, %c0_25, %c0_26, %c0_27] : memref<1x1x1x128xf32, #tpu.memory_space<vmem>>, vector<1x1x1x128xf32>
      tpu.vector_store %arg7[%c0_24, %c0_25, %c0_26, %c0_27], %47 {strides = array<i32>} : memref<1x1x1x128xf32, #tpu.memory_space<vmem>>, vector<1x1x1x128xf32>,
    } else {
    }
    %c1_i32 = arith.constant 1 : i32
    %14 = arith.cmpi eq, %arg1, %c1_i32 : i32
    %c5_i32 = arith.constant 5 : i32
    %15 = arith.cmpi eq, %arg1, %c5_i32 : i32
    %16 = arith.ori %14, %15 : i1
    %17 = arith.extui %16 : i1 to i32
    %c0_i32_14 = arith.constant 0 : i32
    %18 = arith.cmpi ne, %17, %c0_i32_14 : i32
    scf.if %18 {
      %24 = arith.subf %4, %6 : vector<2x128xf32>
      %25 = arith.mulf %24, %24 : vector<2x128xf32>
      %26 = arith.mulf %25, %8 : vector<2x128xf32>
      %cst = arith.constant dense<0.000000e+00> : vector<128xf32>
      %27 = vector.multi_reduction <add>, %26, %cst [0] : vector<2x128xf32> to vector<128xf32>
      %28 = vector.shape_cast %27 : vector<128xf32> to vector<1x128xf32>
      %29 = vector.broadcast %10 : f32 to vector<1x128xf32>
      %30 = arith.mulf %28, %29 : vector<1x128xf32>
      %c0_16 = arith.constant 0 : index
      %c0_17 = arith.constant 0 : index
      %c0_18 = arith.constant 0 : index
      %c0_19 = arith.constant 0 : index
      %31 = vector.load %arg7[%c0_16, %c0_17, %c0_18, %c0_19] : memref<1x1x1x128xf32, #tpu.memory_space<vmem>>, vector<1x1x1x128xf32>
      %32 = vector.shape_cast %30 : vector<1x128xf32> to vector<1x1x1x128xf32>
      %33 = arith.addf %31, %32 : vector<1x1x1x128xf32>
      %c0_20 = arith.constant 0 : index
      %c0_21 = arith.constant 0 : index
      %c0_22 = arith.constant 0 : index
      %c0_23 = arith.constant 0 : index
      %34 = vector.load %arg7[%c0_20, %c0_21, %c0_22, %c0_23] : memref<1x1x1x128xf32, #tpu.memory_space<vmem>>, vector<1x1x1x128xf32>
      tpu.vector_store %arg7[%c0_20, %c0_21, %c0_22, %c0_23], %33 {strides = array<i32>} : memref<1x1x1x128xf32, #tpu.memory_space<vmem>>, vector<1x1x1x128xf32>,
    } else {
    }
    %c2_i32 = arith.constant 2 : i32
    %19 = arith.cmpi sge, %arg1, %c2_i32 : i32
    %c4_i32 = arith.constant 4 : i32
    %20 = arith.cmpi sle, %arg1, %c4_i32 : i32
    %21 = arith.andi %19, %20 : i1
    %22 = arith.extui %21 : i1 to i32
    %c0_i32_15 = arith.constant 0 : i32
    %23 = arith.cmpi ne, %22, %c0_i32_15 : i32
    scf.if %23 {
      %24 = arith.subf %4, %6 : vector<2x128xf32>
      %25 = math.absf %24 : vector<2x128xf32>
      %cst = arith.constant 1.000000e+00 : f32
      %26 = vector.broadcast %cst : f32 to vector<2x128xf32>
      %27 = arith.cmpf olt, %25, %26 : vector<2x128xf32>
      %cst_16 = arith.constant 5.000000e-01 : f32
      %28 = vector.broadcast %cst_16 : f32 to vector<2x128xf32>
      %29 = arith.mulf %28, %24 : vector<2x128xf32>
      %30 = arith.mulf %29, %24 : vector<2x128xf32>
      %cst_17 = arith.constant 5.000000e-01 : f32
      %31 = vector.broadcast %cst_17 : f32 to vector<2x128xf32>
      %32 = arith.subf %25, %31 : vector<2x128xf32>
      %33 = arith.select %27, %30, %32 : vector<2x128xi1>, vector<2x128xf32>
      %34 = arith.mulf %33, %8 : vector<2x128xf32>
      %cst_18 = arith.constant dense<0.000000e+00> : vector<128xf32>
      %35 = vector.multi_reduction <add>, %34, %cst_18 [0] : vector<2x128xf32> to vector<128xf32>
      %36 = vector.shape_cast %35 : vector<128xf32> to vector<1x128xf32>
      %37 = vector.broadcast %10 : f32 to vector<1x128xf32>
      %38 = arith.mulf %36, %37 : vector<1x128xf32>
      %c0_19 = arith.constant 0 : index
      %c0_20 = arith.constant 0 : index
      %c0_21 = arith.constant 0 : index
      %c0_22 = arith.constant 0 : index
      %39 = vector.load %arg7[%c0_19, %c0_20, %c0_21, %c0_22] : memref<1x1x1x128xf32, #tpu.memory_space<vmem>>, vector<1x1x1x128xf32>
      %40 = vector.shape_cast %38 : vector<1x128xf32> to vector<1x1x1x128xf32>
      %41 = arith.addf %39, %40 : vector<1x1x1x128xf32>
      %c0_23 = arith.constant 0 : index
      %c0_24 = arith.constant 0 : index
      %c0_25 = arith.constant 0 : index
      %c0_26 = arith.constant 0 : index
      %42 = vector.load %arg7[%c0_23, %c0_24, %c0_25, %c0_26] : memref<1x1x1x128xf32, #tpu.memory_space<vmem>>, vector<1x1x1x128xf32>
      tpu.vector_store %arg7[%c0_23, %c0_24, %c0_25, %c0_26], %41 {strides = array<i32>} : memref<1x1x1x128xf32, #tpu.memory_space<vmem>>, vector<1x1x1x128xf32>,
    } else {
    }
    return
  }
  func.func @transform_0(%arg0: i32, %arg1: i32, %arg2: i32, %arg3: memref<6xf32, #tpu.memory_space<smem>>) -> (i32, i32, i32, i32) {
    %c0_i32 = arith.constant 0 : i32
    %c0_i32_0 = arith.constant 0 : i32
    return %arg0, %arg1, %arg2, %c0_i32 : i32, i32, i32, i32
  }
  func.func @transform_1(%arg0: i32, %arg1: i32, %arg2: i32, %arg3: memref<6xf32, #tpu.memory_space<smem>>) -> (i32, i32, i32, i32) {
    %c0_i32 = arith.constant 0 : i32
    %c0_i32_0 = arith.constant 0 : i32
    return %arg0, %arg1, %arg2, %c0_i32 : i32, i32, i32, i32
  }
  func.func @transform_2(%arg0: i32, %arg1: i32, %arg2: i32, %arg3: memref<6xf32, #tpu.memory_space<smem>>) -> (i32, i32, i32, i32) {
    %c0_i32 = arith.constant 0 : i32
    %c0_i32_0 = arith.constant 0 : i32
    return %arg0, %arg1, %arg2, %c0_i32 : i32, i32, i32, i32
  }
  func.func @transform_3(%arg0: i32, %arg1: i32, %arg2: i32, %arg3: memref<6xf32, #tpu.memory_space<smem>>) -> (i32, i32, i32, i32) {
    %c0_i32 = arith.constant 0 : i32
    %c0_i32_0 = arith.constant 0 : i32
    %c0_i32_1 = arith.constant 0 : i32
    return %arg0, %arg1, %c0_i32, %c0_i32_0 : i32, i32, i32, i32
  }
}

</mosaic_0001>

<bundles_post_ra>
// kernel: tpu_custom_call.1
= control target key start
LH: loop header
LB: loop body
LE: loop exit
PB: predicated region body
PF: predicated region fallthrough
CT: control target
= control target key end

     0   :  { %s862_s15 = smov [#allocation3]   ;;  %s1150_s0 = inlined_call_operand.hbm [shape: f32[6], index: 0, kind: input, shape index: {}]   ;;  %s1151_s1 = inlined_call_operand.hbm [shape: f32[2,6,2,128], index: 1, kind: input, shape index: {}]   ;;  %s1152_s2 = inlined_call_operand.hbm [shape: f32[2,6,2,128], index: 2, kind: input, shape index: {}]   ;;  %s1153_s3 = inlined_call_operand.hbm [shape: f32[2,6,2,128], index: 3, kind: input, shape index: {}]   ;;  %s1154_s4 = inlined_call_operand.hbm [shape: f32[2,6,1,128], index: 4, kind: output, shape index: {}]  }
   0x1   :  { %1160 = sst [smem:[#allocation20_spill]] %s1152_s2 }
   0x2   :  { %10 = dma.hbm_to_smem %s1150_s0, 16, %s862_s15, [#allocation2] }
   0x3   :  { %816 = dma.done.wait [#allocation2], 16 }
   0x4   :  { %817 = vsyncadd [#allocation2], 4294967280 }
   0x5   :  { %12 = sfence }
   0x6   :  { %13 = vsyncpa [#allocation5], 0 }
   0x7   :  { %15 = vsyncpa [#allocation5 + $0x1], 0 }
   0x8   :  { %16 = vsyncpa [#allocation8], 0 }
   0x9   :  { %18 = vsyncpa [#allocation8 + $0x1], 0 }
   0xa   :  { %19 = vsyncpa [#allocation6], 0 }
   0xb   :  { %21 = vsyncpa [#allocation6 + $0x1], 0  ;;  %s896_s18 = smov 0   ;;  %s898_s19 = smov 0  }
   0xc   :  { %s900_s20 = smov 0   ;;  %s902_s21 = smov 0  }
   0xd   :  { %s904_s22 = smov 0   ;;  %s906_s0 = smov 0  }
   0xe   :  { %s908_s23 = smov 0   ;;  %s910_s24 = smov 0  }
   0xf LB: > { %1161 = sst [smem:[#allocation15_spill]] %s852_s0  ;;  %s937_s25 = sadd.s32 4294967295, %s860_s24   ;;  %s860_s24 = sphi %s910_s24, %s27_s24   ;;  %s856_s23 = sphi %s908_s23, %s1178_s23   ;;  %s852_s0 = sphi %s906_s0, %s1177_s0   ;;  %s848_s22 = sphi %s904_s22, %s1176_s22   ;;  %s844_s21 = sphi %s902_s21, %s1175_s21   ;;  %s840_s20 = sphi %s900_s20, %s1181_s20   ;;  %s836_s19 = sphi %s898_s19, %s1180_s19   ;;  %s832_s18 = sphi %s896_s18, %s1179_s18  }
  0x10   : > { %1162 = sst [smem:[#allocation16_spill]] %s856_s23  ;;  %s550_s26 = sadd.s32 4294967294, %s860_s24  }
  0x11   : > { %s42_s27 = sadd.s32 1, %s852_s0  ;;  %s46_s28 = sadd.s32 1, %s856_s23 }
  0x12   : > { %p44_p0 = scmp.ge.s32.totalorder %s42_s27, 6  ;;  %s57_s29 = sadd.s32 1, %s840_s20 }
  0x13   : > { %p64_p1 = scmp.ne.s32.totalorder %s840_s20, %s836_s19  ;;  %p65_p2 = scmp.eq.s32.totalorder %s860_s24, 0 }
  0x14   : > { %s1183_s27 = smov (%p44_p0, %s42_s27), 0  ;;  %s1185_s28 = smov (!%p44_p0, %s46_s28), %s856_s23 }
  0x15   : > { %1163 = sst [smem:[#allocation17_spill]] %s1183_s27  ;;  %s51_s30 = ssub.s32 %s852_s0, %s1183_s27 }
  0x16   : > { %p951_p3 = por %p65_p2, %p64_p1  ;;  %p48_p4 = scmp.ge.s32.totalorder %s1185_s28, 2 }
  0x17   : > { %p70_p5 = scmp.ne.s32.totalorder %s836_s19, %s832_s18  ;;  %p71_p6 = scmp.eq.s32.totalorder %s937_s25, 0 }
  0x18   : > { %p156_p7 = scmp.eq.s32.totalorder %s937_s25, 11  ;;  %s1187_s28 = smov (%p48_p4, %s1185_s28), 0 }
  0x19   : > { %1165 = sst [smem:[#allocation18_spill]] %s1187_s28  ;;  %p961_p8 = por %p71_p6, %p70_p5 }
  0x1a   : > { %p965_p9 = por %p156_p7, %p64_p1  ;;  %s50_s8 = ssub.s32 %s856_s23, %s1187_s28 }
  0x1b   : > { %p162_p10 = scmp.eq.s32.totalorder %s550_s26, 11  ;;  %s52_s9 = sor.u32 %s51_s30, %s50_s8 }
  0x1c   : > { %p55_p11 = scmp.eq.s32.totalorder %s52_s9, 0  ;;  %p594_p13 = scmp.lt.s32.totalorder %s860_s24, 12 }
  0x1d   : > { %p971_p12 = por %p162_p10, %p70_p5  ;;  %s1155_s11 = sand.u32 1, %s840_s20  }
  0x1e   : > { %s978_s12 = scalar_select %p55_p11, %s840_s20, %s57_s29  }
  0x1f   : > { %s982_s13 = sshll.u32 %s1155_s11, 1  ;;  %s568_s14 = smul.u32 6, %s856_s23 }
  0x20   : > { %1169 = sst [smem:[#allocation19_spill]] %s978_s12  ;;  %p987_p0 = pnand %p594_p13, %p951_p3 }
  0x21   : > { %s203_s16 = sand.u32 1, %s860_s24   ;;  %s192_s17 = sadd.s32 %s852_s0, %s568_s14 }
  0x22   : > { %s993_s26 = sshll.u32 %s192_s17, 5  ;;  %s1171_s2 = sld [smem:[#allocation20_spill]] }
  0x23   : > { %s207_s9 = scalar_lea.vmem [#allocation7], %s982_s13  ;;  %p559_p1 = scmp.ge.s32.totalorder %s860_s24, 1 }
  0x24   : > { %s217_s11 = sshll.u32 %s207_s9, 4  ;;  %p243_p2 = scmp.lt.s32.totalorder %s860_s24, 13  ;;  %s218_s11 = int_to_ptr.vmem [resolvable:$true] %s217_s11 }
  0x25   : > { %s1002_s5 = scalar_lea.sflag [#allocation8], %s203_s16  ;;  %p676_p3 = pneg %p987_p0 }
  0x26   : > { %s687_s28 = scalar_lea.vmem %s218_s11, 32  ;;  %s863_s14 = smov [#allocation7]  }
  0x27   : > { %p688_p4 = scmp.ne.s32.totalorder %s218_s11, %s687_s28  ;;  %s692_s17 = sshll.u32 %s863_s14, 4  ;;  %s693_s17 = int_to_ptr.vmem [resolvable:$false] %s692_s17 }
  0x28   : > { %s215_s8 = scalar_lea.hbm %s1171_s2, %s993_s26  ;;  %s694_s30 = scalar_lea.vmem %s693_s17, 64 }
  0x29   : > { %p690_p5 = pnand %p688_p4, %p676_p3  ;;  %p695_p7 = scmp.lt.s32.totalorder %s218_s11, %s693_s17 }
  0x2a   : > { %p696_p10 = scmp.lt.s32.totalorder %s694_s30, %s687_s28 }
  0x2b   : > { %p691_p6 = pneg %p690_p5 }
  0x2c   : > { %p697_p11 = por %p696_p10, %p695_p7 }
  0x2e   : > { %p698_p13 = pnand %p697_p11, %p691_p6 }
  0x30   : > { %701 = shalt.err (!%p698_p13)
}
  0x31   : > { %586 = dma.hbm_to_vmem [thread:$0]  (!%p987_p0), %s215_s8, 32, %s218_s11, %s1002_s5  }
  0x32   : > { %p1016_p4 = pnand %p559_p1, %p243_p2  ;;  %s194_s9 = scalar_lea.hbm %s1151_s1, %s993_s26 }
  0x33   : > { %s186_s14 = scalar_lea.vmem [#allocation4], %s982_s13  ;;  %s236_s27 = scalar_lea.hbm %s1153_s3, %s993_s26 }
  0x34   : > { %s196_s17 = sshll.u32 %s186_s14, 4  ;;  %s1173_s23 = sand.u32 1, %s840_s20   ;;  %s197_s17 = int_to_ptr.vmem [resolvable:$true] %s196_s17 }
  0x35   : > { %s183_s0 = scalar_lea.sflag [#allocation5], %s1173_s23  ;;  %s715_s11 = scalar_lea.vmem %s197_s17, 32 }
  0x36   : > { %p716_p5 = scmp.ne.s32.totalorder %s197_s17, %s715_s11  ;;  %s864_s8 = smov [#allocation4]  }
  0x37   : > { %s720_s12 = sshll.u32 %s864_s8, 4  ;;  %s721_s12 = int_to_ptr.vmem [resolvable:$false] %s720_s12 }
  0x38   : > { %p718_p1 = pnand %p716_p5, %p676_p3  ;;  %s722_s28 = scalar_lea.vmem %s721_s12, 64 }
  0x39   : > { %p723_p6 = scmp.lt.s32.totalorder %s197_s17, %s721_s12  ;;  %p724_p7 = scmp.lt.s32.totalorder %s722_s28, %s715_s11 }
  0x3a   : > { %p719_p2 = pneg %p718_p1 }
  0x3b   : > { %p725_p10 = por %p724_p7, %p723_p6 }
  0x3d   : > { %p726_p11 = pnand %p725_p10, %p719_p2 }
  0x3f   : > { %729 = shalt.err (!%p726_p11)
}
  0x40   : > { %583 = dma.hbm_to_vmem [thread:$0]  (!%p987_p0), %s194_s9, 32, %s197_s17, %s183_s0  }
  0x41   : > { %s228_s2 = scalar_lea.vmem [#allocation9], %s982_s13  ;;  %s865_s14 = smov [#allocation9]  }
  0x42   : > { %s238_s23 = sshll.u32 %s228_s2, 4  ;;  %s748_s12 = sshll.u32 %s865_s14, 4  ;;  %s239_s23 = int_to_ptr.vmem [resolvable:$true] %s238_s23  ;;  %s749_s12 = int_to_ptr.vmem [resolvable:$false] %s748_s12 }
  0x43   : > { %s743_s29 = scalar_lea.vmem %s239_s23, 32  ;;  %s750_s30 = scalar_lea.vmem %s749_s12, 64 }
  0x44   : > { %p744_p13 = scmp.ne.s32.totalorder %s239_s23, %s743_s29  ;;  %p751_p2 = scmp.lt.s32.totalorder %s239_s23, %s749_s12 }
  0x45   : > { %p752_p6 = scmp.lt.s32.totalorder %s750_s30, %s743_s29 }
  0x46   : > { %p746_p5 = pnand %p744_p13, %p676_p3 }
  0x47   : > { %p753_p7 = por %p752_p6, %p751_p2 }
  0x48   : > { %p747_p1 = pneg %p746_p5 }
  0x4a   : > { %p754_p10 = pnand %p753_p7, %p747_p1 }
  0x4c   : > { %757 = shalt.err (!%p754_p10)
}
  0x4d   : > { %589 = dma.hbm_to_vmem [thread:$0]  (!%p987_p0), %s236_s27, 32, %s239_s23, %s1002_s5  }
  0x4e   : > { %247 = sbr.rel (%p1016_p4) target bundleno = 250 (0xfa), region = 32  ;;  %s1051_s9 = sand.u32 (!%p1016_p4), 1, %s836_s19  }
  0x4f   : > { %s560_s17 = sshll.u32 (!%p1016_p4), %s1051_s9, 1  ;;  %s250_s11 = scalar_lea.sflag (!%p1016_p4), [#allocation5], %s1051_s9 }
  0x50   : > { %s253_s8 = scalar_lea.vmem (!%p1016_p4), [#allocation4], %s560_s17 }
  0x53   : > { %819 = dma.done.wait (%p961_p8), %s250_s11, 32  }
  0x54   : > { %821 = vsyncadd (%p961_p8), %s250_s11, 4294967264  ;;  %s258_s27 = sand.u32 1, %s937_s25   ;;  %s262_s26 = scalar_lea.vmem [#allocation7], %s560_s17 }
  0x55   : > { %s259_s15 = scalar_lea.sflag [#allocation8], %s258_s27 }
  0x56   : > { %823 = dma.done.wait (%p961_p8), %s259_s15, 64  }
  0x57   : > { %825 = vsyncadd (%p961_p8), %s259_s15, 4294967232  ;;  %s1065_s5 = sld [smem:[#allocation3 + %s844_s21]]  ;;  %s1068_s16 = scalar_lea.vmem [#allocation10], %s1051_s9  ;;  %v866_v0 = vmov 0.0   ;;  %v1071_v1 = vld [vmem:[%s253_s8] sm:$0x3] }
  0x58   : > { %307 = vst [vmem:[%s1068_s16] sm:$0x1] %v866_v0  ;;  %v1073_v2 = vld [vmem:[%s262_s26] sm:$0x3]  ;;  %s271_s25 = scalar_lea.vmem [#allocation9], %s560_s17  ;;  %p563_p0 = scmp.ne.s32.totalorder %s844_s21, 0 }
  0x59   : > { %v1075_v3 = vld [vmem:[%s271_s25] sm:$0x3] }
  0x5a   : > { %315 = sbr.rel (%p563_p0) target bundleno = 162 (0xa2), region = 52 }
  0x5f   : > { %v317_v4 = vand.u32 2147483647, %v1071_v1  ;;  %v316_v14 = vmax.f32 %v1071_v1, 0.0  ;;  %v334_v16 = vsub.f32 1.0, %v1073_v2  ;;  %v331_v19 = vmul.f32 2.0, %v1073_v2 }
  0x60   : > { %vm338_vm1 = vcmask 1041408   ;;  %v346_v31 = vstv %s1065_s5  ;;  %v348_v33 = vld [vmem:[%s1068_s16] sm:$0x1] }
  0x61   : > { %v318_v5 = vsub.f32 0.0, %v317_v4 }
  0x63   : > { %v319_v6 = vmul.f32 1.442695, %v318_v5 }
  0x65   : > { %662 = vpow2.f32 %v319_v6 }
  0x72   : > { %v663_v7 = vpop.eup %662 }
  0x73   : > { %v321_v8 = vadd.f32 1.0, %v663_v7  ;;  %v324_v9 = vmul.f32 -0.5, %v663_v7  ;;  %v327_v11 = vand.u32 2147483647, %v663_v7 }
  0x75   : > { %664 = vlog2.f32 %v321_v8  ;;  %v325_v10 = vadd.f32 1.0, %v324_v9  ;;  %vm328_vm0 = vcmp.lt.f32.partialorder %v327_v11, 0.0004427343 }
  0x77   : > { %v326_v12 = vmul.f32 %v663_v7, %v325_v10 }
  0x82   : > { %v665_v13 = vpop.eup %664 }
  0x83   : > { %v323_v15 = vmul.f32 0.6931472, %v665_v13 }
  0x85   : > { %v329_v17 = vsel %vm328_vm0, %v326_v12, %v323_v15 }
  0x86   : > { %v330_v18 = vadd.f32 %v329_v17, %v316_v14 }
  0x88   : > { %v332_v20 = vsub.f32 %v330_v18, %v1071_v1  ;;  %v335_v21 = vmul.f32 %v334_v16, %v330_v18 }
  0x8a   : > { %v333_v22 = vmul.f32 %v332_v20, %v331_v19 }
  0x8c   : > { %v336_v23 = vadd.f32 %v335_v21, %v333_v22 }
  0x8e   : > { %v337_v24 = vmul.f32 %v336_v23, %v1075_v3 }
  0x90   : > { %v339_v25 = vsel %vm338_vm1, %v337_v24, 0.0 }
  0x91   : > { %v340_v26 = vrot.slane %v339_v25, 4 }
  0x93   : > { %v341_v27 = vadd.f32 %v340_v26, %v339_v25 }
  0x95   : > { %v342_v28 = vrot.slane %v341_v27, 2 }
  0x97   : > { %v343_v29 = vadd.f32 %v342_v28, %v341_v27 }
  0x99   : > { %v344_v30 = vrot.slane %v343_v29, 1 }
  0x9b   : > { %v345_v32 = vadd.f32 %v344_v30, %v343_v29 }
  0x9d   : > { %v347_v34 = vmul.f32 %v346_v31, %v345_v32 }
  0x9f   : > { %v349_v35 = vadd.f32 %v348_v33, %v347_v34 }
  0xa1   : > { %350 = vst [vmem:[%s1068_s16] sm:$0x1] %v349_v35 }
  0xa2 PF: > { %p351_p8 = scmp.eq.s32.totalorder %s844_s21, 1  ;;  %p352_p3 = scmp.eq.s32.totalorder %s844_s21, 5 }
  0xa4   : > { %p353_p4 = por %p352_p3, %p351_p8 }
  0xa5   : > { %v357_v36 = vsub.f32 (%p353_p4), %v1071_v1, %v1073_v2  ;;  %vm360_vm2 = vcmask (%p353_p4), 1041408   ;;  %v368_v45 = vstv (%p353_p4), %s1065_s5 }
  0xa6   : > { %356 = sbr.rel (!%p353_p4) target bundleno = 189 (0xbd), region = 56 }
  0xa7   : > { %v358_v37 = vmul.f32 (%p353_p4), %v357_v36, %v357_v36 }
  0xa8   : > { %v370_v47 = vld [vmem:[%s1068_s16] sm:$0x1] (%p353_p4) }
  0xa9   : > { %v359_v38 = vmul.f32 (%p353_p4), %v358_v37, %v1075_v3 }
  0xab   : > { %v361_v39 = vsel %vm360_vm2, %v359_v38, 0.0 }
  0xac   : > { %v362_v40 = vrot.slane %v361_v39, 4 }
  0xae   : > { %v363_v41 = vadd.f32 %v362_v40, %v361_v39 }
  0xb0   : > { %v364_v42 = vrot.slane %v363_v41, 2 }
  0xb2   : > { %v365_v43 = vadd.f32 %v364_v42, %v363_v41 }
  0xb4   : > { %v366_v44 = vrot.slane %v365_v43, 1 }
  0xb6   : > { %v367_v46 = vadd.f32 %v366_v44, %v365_v43 }
  0xb8   : > { %v369_v48 = vmul.f32 %v368_v45, %v367_v46 }
  0xba   : > { %v371_v49 = vadd.f32 %v370_v47, %v369_v48 }
  0xbc   : > { %372 = vst [vmem:[%s1068_s16] sm:$0x1] %v371_v49 }
  0xbd PF: > { %p373_p11 = scmp.ge.s32.totalorder %s844_s21, 2  ;;  %p374_p13 = scmp.le.s32.totalorder %s844_s21, 4 }
  0xbf   : > { %p375_p5 = pnand %p374_p13, %p373_p11 }
  0xc1   : > { %378 = sbr.rel (%p375_p5) target bundleno = 225 (0xe1), region = 60 }
  0xc6   : > { %v379_v50 = vsub.f32 %v1071_v1, %v1073_v2  ;;  %vm387_vm4 = vcmask 1041408   ;;  %v395_v63 = vstv %s1065_s5  ;;  %v397_v1 = vld [vmem:[%s1068_s16] sm:$0x1] }
  0xc8   : > { %v380_v51 = vand.u32 2147483647, %v379_v50  ;;  %v382_v52 = vmul.f32 0.5, %v379_v50 }
  0xca   : > { %vm381_vm3 = vcmp.lt.f32.partialorder %v380_v51, 1.0  ;;  %v383_v53 = vmul.f32 %v382_v52, %v379_v50  ;;  %v564_v54 = vadd.f32 -0.5, %v380_v51 }
  0xcc   : > { %v385_v55 = vsel %vm381_vm3, %v383_v53, %v564_v54 }
  0xcd   : > { %v386_v56 = vmul.f32 %v385_v55, %v1075_v3 }
  0xcf   : > { %v388_v57 = vsel %vm387_vm4, %v386_v56, 0.0 }
  0xd0   : > { %v389_v58 = vrot.slane %v388_v57, 4 }
  0xd2   : > { %v390_v59 = vadd.f32 %v389_v58, %v388_v57 }
  0xd4   : > { %v391_v60 = vrot.slane %v390_v59, 2 }
  0xd6   : > { %v392_v61 = vadd.f32 %v391_v60, %v390_v59 }
  0xd8   : > { %v393_v62 = vrot.slane %v392_v61, 1 }
  0xda   : > { %v394_v0 = vadd.f32 %v393_v62, %v392_v61 }
  0xdc   : > { %v396_v2 = vmul.f32 %v395_v63, %v394_v0 }
  0xde   : > { %v398_v4 = vadd.f32 %v397_v1, %v396_v2 }
  0xe0   : > { %399 = vst [vmem:[%s1068_s16] sm:$0x1] %v398_v4 }
  0xe1 PF: > { %s571_s6 = smul.u32 6, %s848_s22  ;;  %s415_s28 = sshll.u32 %s1068_s16, 4  ;;  %s416_s28 = int_to_ptr.vmem [resolvable:$true] %s415_s28 }
  0xe2   : > { %s401_s30 = scalar_lea.sflag [#allocation6], %s1051_s9  ;;  %s758_s0 = scalar_lea.vmem %s416_s28, 16 }
  0xe3   : > { %s411_s2 = sadd.s32 %s844_s21, %s571_s6  ;;  %p759_p1 = scmp.ne.s32.totalorder %s416_s28, %s758_s0 }
  0xe4   : > { %s565_s23 = sshll.u32 %s411_s2, 4  ;;  %s867_s13 = smov [#allocation10]  }
  0xe5   : > { %s413_s12 = scalar_lea.hbm %s1154_s4, %s565_s23  ;;  %p760_p2 = pnand %p759_p1, %p965_p9 }
  0xe6   : > { %s762_s17 = sshll.u32 %s867_s13, 4  ;;  %s763_s17 = int_to_ptr.vmem [resolvable:$false] %s762_s17 }
  0xe7   : > { %p761_p6 = pneg %p760_p2  ;;  %s764_s11 = scalar_lea.vmem %s763_s17, 32 }
  0xe8   : > { %p765_p7 = scmp.lt.s32.totalorder %s416_s28, %s763_s17  ;;  %p766_p10 = scmp.lt.s32.totalorder %s764_s11, %s758_s0 }
  0xea   : > { %p767_p0 = por %p766_p10, %p765_p7 }
  0xec   : > { %p768_p8 = pnand %p767_p0, %p761_p6 }
  0xee   : > { %771 = shalt.err (!%p768_p8)
}
  0xef   : > { %s772_s21 = scalar_lea.hbm %s413_s12, 16  ;;  %s776_s8 = scalar_lea.hbm %s1154_s4, 192 }
  0xf0   : > { %p773_p3 = scmp.ne.s32.totalorder %s413_s12, %s772_s21  ;;  %p777_p13 = scmp.lt.s32.totalorder %s413_s12, %s1154_s4 }
  0xf1   : > { %p778_p5 = scmp.lt.s32.totalorder %s776_s8, %s772_s21 }
  0xf2   : > { %p774_p4 = pnand %p773_p3, %p965_p9 }
  0xf3   : > { %p779_p1 = por %p778_p5, %p777_p13 }
  0xf4   : > { %p775_p11 = pneg %p774_p4 }
  0xf6   : > { %p780_p2 = pnand %p779_p1, %p775_p11 }
  0xf8   : > { %783 = shalt.err (!%p780_p2)
}
  0xf9   : > { %578 = dma.vmem_to_hbm [thread:$0]  (%p965_p9), %s416_s28, 16, %s413_s12, %s401_s30  }
  0xfa PF: > { %p595_p6 = scmp.ge.s32.totalorder %s860_s24, 2  ;;  %s427_s26 = sand.u32 1, %s832_s18  }
  0xfb   : > { %s428_s5 = scalar_lea.sflag [#allocation6], %s427_s26 }
  0xfc   : > { %p591_p7 = pnand %p595_p6, %p971_p12 }
  0xfe   : > { %p592_p10 = pneg %p591_p7 }
 0x100   : > { %827 = dma.done.wait (%p592_p10), %s428_s5, 16  }
 0x101   : > { %829 = vsyncadd (%p592_p10), %s428_s5, 4294967280  ;;  %s27_s24 = sadd.s32 1, %s860_s24   ;;  %s1174_s16 = sld [smem:[#allocation19_spill]] }
 0x102   : > { %p24_p0 = scmp.ge.s32.totalorder %s27_s24, 14   ;;  %s1175_s21 = sld [smem:[#allocation15_spill]] }
 0x103   : > { %s1176_s22 = sld [smem:[#allocation16_spill]]  ;;  %s1179_s18 = smov %s836_s19 }
 0x104   : > { %s1177_s0 = sld [smem:[#allocation17_spill]]  ;;  %s1180_s19 = smov %s840_s20 }
 0x105   : > { %s1178_s23 = sld [smem:[#allocation18_spill]]  ;;  %26 = sbr.rel (!%p24_p0) target bundleno = 15 (0xf), region = 117 }
 0x107   : > { %s1181_s20 = smov %s1174_s16 }
 0x10a   :  { %432 = vsyncpa [#allocation5], 1 }
 0x10b   :  { %434 = vsyncpa [#allocation5 + $0x1], 1 }
 0x10c   :  { %435 = vsyncpa [#allocation8], 1 }
 0x10d   :  { %437 = vsyncpa [#allocation8 + $0x1], 1 }
 0x10e   :  { %438 = vsyncpa [#allocation6], 1 }
 0x10f   :  { %440 = vsyncpa [#allocation6 + $0x1], 1 }

</bundles_post_ra>
